<compile_context>
chip_gen: v7x
topology: tpu7x:2x2x1
jax: 0.10.0
libtpu: 0.0.40
codegen_flags: <defaults>
</compile_context>

<pallas_src>
import jax
import jax.numpy as jnp
from jax.experimental import pallas as pl
from jax.experimental.pallas import tpu as pltpu

# Logical / padded dimensions.
D_IN, D_IN_P = 392, 512
H1, H1_P = 200, 256
H2, H2_P = 20, 128
OUT, OUT_P = 2, 128


def _round_up(n, m):
    return ((n + m - 1) // m) * m


def fcnet_kernel(x_ref, w1_ref, b1_ref, w2_ref, b2_ref, w3_ref, b3_ref,
                 h2_ref, out_ref):
    x = x_ref[...]                                                    # (TB, 512) bf16

    # fc1 + ReLU (f32 accumulate on the MXU).
    h1 = jnp.dot(x, w1_ref[...], preferred_element_type=jnp.float32) + b1_ref[...]
    h1 = jnp.maximum(h1, 0.0)                                         # (TB, 256) f32

    # Dropout(0.25): identity (eval mode).

    # fc2 pre-activation: this is what x1/x2 are sliced from (outside the kernel).
    h2 = jnp.dot(h1.astype(jnp.bfloat16), w2_ref[...],
                 preferred_element_type=jnp.float32) + b2_ref[...]    # (TB, 128) f32
    h2_ref[...] = h2                                                  # lane-dense store

    # ReLU then fc3.
    h2r = jnp.maximum(h2, 0.0).astype(jnp.bfloat16)
    out_ref[...] = jnp.dot(h2r, w3_ref[...],
                           preferred_element_type=jnp.float32) + b3_ref[...]


def init_params(key):
    """Deterministic init matching nn.Linear fan-in uniform (stored as (in, out))."""
    k = jax.random.split(key, 6)

    def uniform(key, shape, fan_in):
        bound = 1.0 / (fan_in ** 0.5)
        return jax.random.uniform(key, shape, jnp.float32, -bound, bound)

    w1 = uniform(k[0], (D_IN, H1), float(D_IN))
    b1 = uniform(k[1], (H1,), float(D_IN))
    w2 = uniform(k[2], (H1, H2), float(H1))
    b2 = uniform(k[3], (H2,), float(H1))
    w3 = uniform(k[4], (H2, OUT), float(H2))
    b3 = uniform(k[5], (OUT,), float(H2))
    return (w1, b1, w2, b2, w3, b3)


def pack_params(params):
    """Zero-pad to lane-clean shapes; weights -> bf16, biases -> f32 (1, N)."""
    w1, b1, w2, b2, w3, b3 = params

    def pad_w(w, rows, cols):
        return jnp.pad(w, ((0, rows - w.shape[0]),
                           (0, cols - w.shape[1]))).astype(jnp.bfloat16)

    def pad_b(b, cols):
        return jnp.pad(b, (0, cols - b.shape[0])).reshape(1, cols).astype(jnp.float32)

    return (pad_w(w1, D_IN_P, H1_P), pad_b(b1, H1_P),
            pad_w(w2, H1_P, H2_P), pad_b(b2, H2_P),
            pad_w(w3, H2_P, OUT_P), pad_b(b3, OUT_P))


def fcnet_forward(x, packed_params, *, max_tb=256):
    """x: (B, C, H, W) float32 with C*H*W == 392. Returns (out, x1, x2)."""
    B = x.shape[0]
    x_flat = x.reshape(B, -1)
    assert x_flat.shape[1] == D_IN

    # Batch tile: multiple of 8 sublanes, capped (256 keeps MXU rows full on v6e/v7x
    # and stays far under v7x's 32 MiB scoped VMEM even with double-buffering).
    TB = min(max_tb, _round_up(B, 8))
    B_pad = _round_up(B, TB)

    x_p = jnp.pad(x_flat, ((0, B_pad - B), (0, D_IN_P - D_IN))).astype(jnp.bfloat16)

    w1, b1, w2, b2, w3, b3 = packed_params
    const = lambda i: (0, 0)   # weights/biases: same block every step -> VMEM-resident

    h2_p, out_p = pl.pallas_call(
        fcnet_kernel,
        out_shape=(
            jax.ShapeDtypeStruct((B_pad, H2_P), jnp.float32),   # fc2 pre-activation
            jax.ShapeDtypeStruct((B_pad, OUT_P), jnp.float32),  # fc3 output
        ),
        grid=(B_pad // TB,),
        in_specs=[
            pl.BlockSpec((TB, D_IN_P), lambda i: (i, 0)),
            pl.BlockSpec((D_IN_P, H1_P), const),
            pl.BlockSpec((1, H1_P), const),
            pl.BlockSpec((H1_P, H2_P), const),
            pl.BlockSpec((1, H2_P), const),
            pl.BlockSpec((H2_P, OUT_P), const),
            pl.BlockSpec((1, OUT_P), const),
        ],
        out_specs=(
            pl.BlockSpec((TB, H2_P), lambda i: (i, 0)),
            pl.BlockSpec((TB, OUT_P), lambda i: (i, 0)),
        ),
        compiler_params=pltpu.CompilerParams(
            dimension_semantics=("parallel",)),
    )(x_p, w1, b1, w2, b2, w3, b3)

    out = out_p[:B, :OUT]
    x1 = h2_p[:B, 0:10]
    x2 = h2_p[:B, 10:20]
    return out, x1, x2


def reference_forward(x, packed_params):
    """Pure-JAX reference mirroring the kernel's bf16-weight / f32-accumulate path."""
    w1, b1, w2, b2, w3, b3 = packed_params
    B = x.shape[0]
    xf = jnp.pad(x.reshape(B, -1), ((0, 0), (0, D_IN_P - D_IN))).astype(jnp.bfloat16)

    h1 = jnp.maximum(xf.astype(jnp.float32) @ w1.astype(jnp.float32) + b1, 0.0)
    h2 = (h1.astype(jnp.bfloat16).astype(jnp.float32) @ w2.astype(jnp.float32) + b2)
    x1, x2 = h2[:, 0:10], h2[:, 10:20]
    out = (jnp.maximum(h2, 0.0).astype(jnp.bfloat16).astype(jnp.float32)
           @ w3.astype(jnp.float32) + b3)
    return out[:, :OUT], x1, x2


if __name__ == "__main__":
    key = jax.random.PRNGKey(0)
    k_params, k_x = jax.random.split(key)

    params = pack_params(init_params(k_params))
    # NCHW input: (B=8, C=2, H=14, W=14) -> 2*14*14 = 392 features
    x = jax.random.normal(k_x, (8, 2, 14, 14), jnp.float32)

    out, x1, x2 = fcnet_forward(x, params)
    jax.block_until_ready((out, x1, x2))

    ref_out, ref_x1, ref_x2 = reference_forward(x, params)
    assert out.shape == (8, 2) and x1.shape == (8, 10) and x2.shape == (8, 10)
    assert jnp.allclose(out, ref_out, atol=1e-3, rtol=1e-3)
    assert jnp.allclose(x1, ref_x1, atol=1e-3, rtol=1e-3)
    assert jnp.allclose(x2, ref_x2, atol=1e-3, rtol=1e-3)

    print("KERNEL_OK")
</pallas_src>

<mosaic_0001>
module attributes {stable_mosaic.version = 11 : i64} {
  func.func @fcnet_kernel(%arg0: i32, %arg1: memref<8x512xbf16, #tpu.memory_space<vmem>>, %arg2: memref<512x256xbf16, #tpu.memory_space<vmem>>, %arg3: memref<1x256xf32, #tpu.memory_space<vmem>>, %arg4: memref<256x128xbf16, #tpu.memory_space<vmem>>, %arg5: memref<1x128xf32, #tpu.memory_space<vmem>>, %arg6: memref<128x128xbf16, #tpu.memory_space<vmem>>, %arg7: memref<1x128xf32, #tpu.memory_space<vmem>>, %arg8: memref<8x128xf32, #tpu.memory_space<vmem>>, %arg9: memref<8x128xf32, #tpu.memory_space<vmem>>) attributes {dimension_semantics = [#tpu.dimension_semantics<parallel>], iteration_bounds = array<i64: 1>, scalar_prefetch = 0 : i64, scratch_operands = 0 : i64, tpu.core_type = #tpu.core_type<tc>, window_params = [{transform_indices = @transform_0, window_bounds = array<i64: 8, 512>}, {pipeline_mode = #tpu.pipeline_mode<synchronous>, transform_indices = @transform_1, window_bounds = array<i64: 512, 256>}, {pipeline_mode = #tpu.pipeline_mode<synchronous>, transform_indices = @transform_2, window_bounds = array<i64: 1, 256>}, {pipeline_mode = #tpu.pipeline_mode<synchronous>, transform_indices = @transform_3, window_bounds = array<i64: 256, 128>}, {pipeline_mode = #tpu.pipeline_mode<synchronous>, transform_indices = @transform_4, window_bounds = array<i64: 1, 128>}, {pipeline_mode = #tpu.pipeline_mode<synchronous>, transform_indices = @transform_5, window_bounds = array<i64: 128, 128>}, {pipeline_mode = #tpu.pipeline_mode<synchronous>, transform_indices = @transform_6, window_bounds = array<i64: 1, 128>}, {transform_indices = @transform_7, window_bounds = array<i64: 8, 128>}, {transform_indices = @transform_8, window_bounds = array<i64: 8, 128>}]} {
    %c0 = arith.constant 0 : index
    %c0_0 = arith.constant 0 : index
    %0 = vector.load %arg1[%c0, %c0_0] : memref<8x512xbf16, #tpu.memory_space<vmem>>, vector<8x512xbf16>
    %c0_1 = arith.constant 0 : index
    %c0_2 = arith.constant 0 : index
    %1 = vector.load %arg2[%c0_1, %c0_2] : memref<512x256xbf16, #tpu.memory_space<vmem>>, vector<512x256xbf16>
    %cst = arith.constant dense<0.000000e+00> : vector<8x256xf32>
    %2 = tpu.matmul %0, %1, %cst {dimension_numbers = #tpu.dot_dimension_numbers<[1], [0], [0], [1], [0, 0, 1, 1], [], []>} : vector<8x512xbf16>, vector<512x256xbf16>, vector<8x256xf32> -> vector<8x256xf32>
    %c0_3 = arith.constant 0 : index
    %c0_4 = arith.constant 0 : index
    %3 = vector.load %arg3[%c0_3, %c0_4] : memref<1x256xf32, #tpu.memory_space<vmem>>, vector<1x256xf32>
    %4 = vector.broadcast %3 : vector<1x256xf32> to vector<8x256xf32>
    %5 = arith.addf %2, %4 : vector<8x256xf32>
    %cst_5 = arith.constant 0.000000e+00 : f32
    %6 = vector.broadcast %cst_5 : f32 to vector<8x256xf32>
    %7 = arith.maximumf %5, %6 : vector<8x256xf32>
    %8 = arith.truncf %7 : vector<8x256xf32> to vector<8x256xbf16>
    %c0_6 = arith.constant 0 : index
    %c0_7 = arith.constant 0 : index
    %9 = vector.load %arg4[%c0_6, %c0_7] : memref<256x128xbf16, #tpu.memory_space<vmem>>, vector<256x128xbf16>
    %cst_8 = arith.constant dense<0.000000e+00> : vector<8x128xf32>
    %10 = tpu.matmul %8, %9, %cst_8 {dimension_numbers = #tpu.dot_dimension_numbers<[1], [0], [0], [1], [0, 0, 1, 1], [], []>} : vector<8x256xbf16>, vector<256x128xbf16>, vector<8x128xf32> -> vector<8x128xf32>
    %c0_9 = arith.constant 0 : index
    %c0_10 = arith.constant 0 : index
    %11 = vector.load %arg5[%c0_9, %c0_10] : memref<1x128xf32, #tpu.memory_space<vmem>>, vector<1x128xf32>
    %12 = vector.broadcast %11 : vector<1x128xf32> to vector<8x128xf32>
    %13 = arith.addf %10, %12 : vector<8x128xf32>
    %c0_11 = arith.constant 0 : index
    %c0_12 = arith.constant 0 : index
    %14 = vector.load %arg8[%c0_11, %c0_12] : memref<8x128xf32, #tpu.memory_space<vmem>>, vector<8x128xf32>
    tpu.vector_store %arg8[%c0_11, %c0_12], %13 {strides = array<i32>} : memref<8x128xf32, #tpu.memory_space<vmem>>, vector<8x128xf32>,
    %cst_13 = arith.constant 0.000000e+00 : f32
    %15 = vector.broadcast %cst_13 : f32 to vector<8x128xf32>
    %16 = arith.maximumf %13, %15 : vector<8x128xf32>
    %17 = arith.truncf %16 : vector<8x128xf32> to vector<8x128xbf16>
    %c0_14 = arith.constant 0 : index
    %c0_15 = arith.constant 0 : index
    %18 = vector.load %arg6[%c0_14, %c0_15] : memref<128x128xbf16, #tpu.memory_space<vmem>>, vector<128x128xbf16>
    %cst_16 = arith.constant dense<0.000000e+00> : vector<8x128xf32>
    %19 = tpu.matmul %17, %18, %cst_16 {dimension_numbers = #tpu.dot_dimension_numbers<[1], [0], [0], [1], [0, 0, 1, 1], [], []>} : vector<8x128xbf16>, vector<128x128xbf16>, vector<8x128xf32> -> vector<8x128xf32>
    %c0_17 = arith.constant 0 : index
    %c0_18 = arith.constant 0 : index
    %20 = vector.load %arg7[%c0_17, %c0_18] : memref<1x128xf32, #tpu.memory_space<vmem>>, vector<1x128xf32>
    %21 = vector.broadcast %20 : vector<1x128xf32> to vector<8x128xf32>
    %22 = arith.addf %19, %21 : vector<8x128xf32>
    %c0_19 = arith.constant 0 : index
    %c0_20 = arith.constant 0 : index
    %23 = vector.load %arg9[%c0_19, %c0_20] : memref<8x128xf32, #tpu.memory_space<vmem>>, vector<8x128xf32>
    tpu.vector_store %arg9[%c0_19, %c0_20], %22 {strides = array<i32>} : memref<8x128xf32, #tpu.memory_space<vmem>>, vector<8x128xf32>,
    return
  }
  func.func @transform_0(%arg0: i32) -> (i32, i32) {
    %c0_i32 = arith.constant 0 : i32
    %c0_i32_0 = arith.constant 0 : i32
    return %arg0, %c0_i32 : i32, i32
  }
  func.func @transform_1(%arg0: i32) -> (i32, i32) {
    %c0_i32 = arith.constant 0 : i32
    %c0_i32_0 = arith.constant 0 : i32
    %c0_i32_1 = arith.constant 0 : i32
    return %c0_i32, %c0_i32_0 : i32, i32
  }
  func.func @transform_2(%arg0: i32) -> (i32, i32) {
    %c0_i32 = arith.constant 0 : i32
    %c0_i32_0 = arith.constant 0 : i32
    %c0_i32_1 = arith.constant 0 : i32
    return %c0_i32, %c0_i32_0 : i32, i32
  }
  func.func @transform_3(%arg0: i32) -> (i32, i32) {
    %c0_i32 = arith.constant 0 : i32
    %c0_i32_0 = arith.constant 0 : i32
    %c0_i32_1 = arith.constant 0 : i32
    return %c0_i32, %c0_i32_0 : i32, i32
  }
  func.func @transform_4(%arg0: i32) -> (i32, i32) {
    %c0_i32 = arith.constant 0 : i32
    %c0_i32_0 = arith.constant 0 : i32
    %c0_i32_1 = arith.constant 0 : i32
    return %c0_i32, %c0_i32_0 : i32, i32
  }
  func.func @transform_5(%arg0: i32) -> (i32, i32) {
    %c0_i32 = arith.constant 0 : i32
    %c0_i32_0 = arith.constant 0 : i32
    %c0_i32_1 = arith.constant 0 : i32
    return %c0_i32, %c0_i32_0 : i32, i32
  }
  func.func @transform_6(%arg0: i32) -> (i32, i32) {
    %c0_i32 = arith.constant 0 : i32
    %c0_i32_0 = arith.constant 0 : i32
    %c0_i32_1 = arith.constant 0 : i32
    return %c0_i32, %c0_i32_0 : i32, i32
  }
  func.func @transform_7(%arg0: i32) -> (i32, i32) {
    %c0_i32 = arith.constant 0 : i32
    %c0_i32_0 = arith.constant 0 : i32
    return %arg0, %c0_i32 : i32, i32
  }
  func.func @transform_8(%arg0: i32) -> (i32, i32) {
    %c0_i32 = arith.constant 0 : i32
    %c0_i32_0 = arith.constant 0 : i32
    return %arg0, %c0_i32 : i32, i32
  }
}

</mosaic_0001>

<bundles_post_ra>
// kernel: tpu_custom_call.1
= control target key start
LH: loop header
LB: loop body
LE: loop exit
PB: predicated region body
PF: predicated region fallthrough
CT: control target
= control target key end

     0   :  { %14 = vsyncpa [#allocation3], 0  ;;  %s1482_s0 = inlined_call_operand.hbm [shape: bf16[8,512], index: 0, kind: input, shape index: {}]   ;;  %s1483_s1 = inlined_call_operand.hbm [shape: bf16[512,256], index: 1, kind: input, shape index: {}]   ;;  %s1484_s2 = inlined_call_operand.vmem [shape: f32[1,256], index: 2, kind: input, shape index: {}]   ;;  %s1485_s3 = inlined_call_operand.hbm [shape: bf16[256,128], index: 3, kind: input, shape index: {}]   ;;  %s1486_s4 = inlined_call_operand.vmem [shape: f32[1,128], index: 4, kind: input, shape index: {}]   ;;  %s1487_s5 = inlined_call_operand.hbm [shape: bf16[128,128], index: 5, kind: input, shape index: {}]   ;;  %s1488_s6 = inlined_call_operand.vmem [shape: f32[1,128], index: 6, kind: input, shape index: {}]   ;;  %s1489_s7 = inlined_call_operand.hbm [shape: f32[8,128], index: 7, kind: output, shape index: {0}]   ;;  %s1490_s8 = inlined_call_operand.hbm [shape: f32[8,128], index: 8, kind: output, shape index: {1}]  }
   0x1   :  { %15 = vsyncpa [#allocation6], 0 }
   0x2   :  { %16 = vsyncpa [#allocation9], 0 }
   0x3   :  { %17 = vsyncpa [#allocation4], 0 }
   0x4   :  { %18 = vsyncpa [#allocation12], 0  ;;  %s1332_s27 = smov [#allocation5]   ;;  %s1190_s9 = scalar_lea.hbm %s1483_s1, 8192 }
   0x5   :  { %s34_s28 = sshll.u32 %s1332_s27, 4  ;;  %p1191_p0 = scmp.ne.s32.totalorder %s1483_s1, %s1190_s9  ;;  %s35_s28 = int_to_ptr.vmem [resolvable:$true] %s34_s28 }
   0x6   :  { %p1194_p1 = scmp.lt.u32.totalorder %s1190_s9, %s1483_s1 }
   0x8   :  { %p1196_p2 = pnand %p1194_p1, %p1191_p0 }
   0xa   :  { %1199 = shalt.err (!%p1196_p2)
}
   0xb   :  { %s1200_s14 = scalar_lea.vmem %s35_s28, 8192  ;;  %p1205_p4 = scmp.lt.s32.totalorder %s35_s28, %s35_s28 }
   0xc   :  { %p1201_p3 = scmp.ne.s32.totalorder %s35_s28, %s1200_s14  ;;  %p1206_p5 = scmp.lt.s32.totalorder %s1200_s14, %s1200_s14 }
   0xe   :  { %p1207_p6 = por %p1206_p5, %p1205_p4 }
  0x10   :  { %p1208_p7 = pnand %p1207_p6, %p1201_p3 }
  0x12   :  { %1211 = shalt.err (!%p1208_p7)
}
  0x13   :  { %s1333_s15 = smov 128   ;;  %s1334_s16 = smov 8  }
  0x14   :  { %40 = dma.hbm_to_vmem [thread:$0]  %s1483_s1, 8192, %s35_s28, [#allocation6], %s1333_s15, %s1333_s15, %s1334_s16  }
  0x15   :  { %s1335_s19 = smov [#allocation2]   ;;  %s1336_s21 = smov [#allocation7]  }
  0x16   :  { %s25_s20 = sshll.u32 %s1335_s19, 4  ;;  %s48_s22 = sshll.u32 %s1336_s21, 4  ;;  %s26_s20 = int_to_ptr.vmem [resolvable:$true] %s25_s20  ;;  %s49_s22 = int_to_ptr.vmem [resolvable:$true] %s48_s22 }
  0x17   :  { %s1212_s25 = scalar_lea.hbm %s1482_s0, 256 }
  0x18   :  { %p1213_p8 = scmp.ne.s32.totalorder %s1482_s0, %s1212_s25  ;;  %p1216_p9 = scmp.lt.u32.totalorder %s1212_s25, %s1482_s0 }
  0x1a   :  { %p1218_p10 = pnand %p1216_p9, %p1213_p8 }
  0x1c   :  { %1221 = shalt.err (!%p1218_p10)
}
  0x1d   :  { %s1222_s1 = scalar_lea.vmem %s26_s20, 256  ;;  %p1227_p12 = scmp.lt.s32.totalorder %s26_s20, %s26_s20 }
  0x1e   :  { %p1223_p11 = scmp.ne.s32.totalorder %s26_s20, %s1222_s1  ;;  %p1228_p13 = scmp.lt.s32.totalorder %s1222_s1, %s1222_s1 }
  0x20   :  { %p1229_p0 = por %p1228_p13, %p1227_p12 }
  0x22   :  { %p1230_p1 = pnand %p1229_p0, %p1223_p11 }
  0x24   :  { %1233 = shalt.err (!%p1230_p1)
}
  0x25   :  { %28 = dma.hbm_to_vmem [thread:$0]  %s1482_s0, 256, %s26_s20, [#allocation3]  }
  0x26   :  { %s1234_s12 = scalar_lea.hbm %s1485_s3, 2048 }
  0x27   :  { %p1235_p2 = scmp.ne.s32.totalorder %s1485_s3, %s1234_s12  ;;  %p1238_p3 = scmp.lt.u32.totalorder %s1234_s12, %s1485_s3 }
  0x29   :  { %p1240_p4 = pnand %p1238_p3, %p1235_p2 }
  0x2b   :  { %1243 = shalt.err (!%p1240_p4)
}
  0x2c   :  { %s1244_s17 = scalar_lea.vmem %s49_s22, 2048  ;;  %p1249_p6 = scmp.lt.s32.totalorder %s49_s22, %s49_s22 }
  0x2d   :  { %p1245_p5 = scmp.ne.s32.totalorder %s49_s22, %s1244_s17  ;;  %p1250_p7 = scmp.lt.s32.totalorder %s1244_s17, %s1244_s17 }
  0x2f   :  { %p1251_p8 = por %p1250_p7, %p1249_p6 }
  0x31   :  { %p1252_p9 = pnand %p1251_p8, %p1245_p5 }
  0x33   :  { %1255 = shalt.err (!%p1252_p9)
}
  0x34   :  { %s1337_s0 = smov 64   ;;  %s1338_s18 = smov 4  }
  0x35   :  { %54 = dma.hbm_to_vmem [thread:$0]  %s1485_s3, 2048, %s49_s22, [#allocation6], %s1337_s0, %s1337_s0, %s1338_s18  }
  0x36   :  { %s1339_s21 = smov [#allocation8]   ;;  %s1256_s26 = scalar_lea.hbm %s1487_s5, 1024 }
  0x37   :  { %s62_s23 = sshll.u32 %s1339_s21, 4  ;;  %p1257_p10 = scmp.ne.s32.totalorder %s1487_s5, %s1256_s26  ;;  %s63_s23 = int_to_ptr.vmem [resolvable:$true] %s62_s23 }
  0x38   :  { %p1260_p11 = scmp.lt.u32.totalorder %s1256_s26, %s1487_s5 }
  0x3a   :  { %p1262_p12 = pnand %p1260_p11, %p1257_p10 }
  0x3c   :  { %1265 = shalt.err (!%p1262_p12)
}
  0x3d   :  { %s1266_s28 = scalar_lea.vmem %s63_s23, 1024  ;;  %p1271_p0 = scmp.lt.s32.totalorder %s63_s23, %s63_s23 }
  0x3e   :  { %p1267_p13 = scmp.ne.s32.totalorder %s63_s23, %s1266_s28  ;;  %p1272_p1 = scmp.lt.s32.totalorder %s1266_s28, %s1266_s28 }
  0x40   :  { %p1273_p2 = por %p1272_p1, %p1271_p0 }
  0x42   :  { %p1274_p3 = pnand %p1273_p2, %p1267_p13 }
  0x44   :  { %1277 = shalt.err (!%p1274_p3)
}
  0x45   :  { %68 = dma.hbm_to_vmem [thread:$0]  %s1487_s5, 1024, %s63_s23, [#allocation9], %s1337_s0, %s1337_s0, %s1338_s18  }
  0x46   :  { %1322 = dma.done.wait [#allocation3], 256  }
  0x47   :  { %1323 = vsyncadd [#allocation3], 4294967040 }
  0x48   :  { %1324 = dma.done.wait [#allocation6], 10240  }
  0x49   :  { %1325 = vsyncadd [#allocation6], 4294957056 }
  0x4a   :  { %1326 = dma.done.wait [#allocation9], 1024  }
  0x4b   :  { %1327 = vsyncadd [#allocation9], 4294966272  ;;  %v1066_v0 = vld [vmem:[#allocation5 + $0x4] ss:$8 sps:$4 sm:$0xff]   ;;  %v1068_v1 = vld [vmem:[#allocation5] ss:$8 sps:$4 sm:$0xff]  }
  0x4c   :  { %496 = vmatprep.subr.bf16.mxu0 %v1066_v0  ;;  %v1069_v2 = vld [vmem:[#allocation5 + $0x14] ss:$8 sps:$4 sm:$0xff]   ;;  %v1071_v3 = vld [vmem:[#allocation5 + $0x10] ss:$8 sps:$4 sm:$0xff]   ;;  %v1072_v4 = vld [vmem:[#allocation5 + $0x24] ss:$8 sps:$4 sm:$0xff]  }
  0x4d   :  { %497 = vmatpush1.bf16.msra.mxu0 %v1068_v1  ;;  %v1074_v5 = vld [vmem:[#allocation5 + $0x20] ss:$8 sps:$4 sm:$0xff]   ;;  %v1075_v6 = vld [vmem:[#allocation5 + $0x34] ss:$8 sps:$4 sm:$0xff]   ;;  %v1077_v7 = vld [vmem:[#allocation5 + $0x30] ss:$8 sps:$4 sm:$0xff]  }
  0x4e   :  { %498 = vmatprep.subr.bf16.mxu0 %v1069_v2  ;;  %v1078_v8 = vld [vmem:[#allocation5 + $0x44] ss:$8 sps:$4 sm:$0xff]   ;;  %v1080_v9 = vld [vmem:[#allocation5 + $0x40] ss:$8 sps:$4 sm:$0xff]   ;;  %v1081_v10 = vld [vmem:[#allocation5 + $0x54] ss:$8 sps:$4 sm:$0xff]  }
  0x4f   :  { %v1083_v11 = vld [vmem:[#allocation5 + $0x50] ss:$8 sps:$4 sm:$0xff]   ;;  %v1084_v12 = vld [vmem:[#allocation5 + $0x64] ss:$8 sps:$4 sm:$0xff]   ;;  %v1086_v15 = vld [vmem:[#allocation5 + $0x60] ss:$8 sps:$4 sm:$0xff]  }
  0x50   :  { %v1437_v13 = vld [vmem:[#allocation2] sm:$0xff]  ;;  %v1090_v18 = vld [vmem:[#allocation5 + $0x84] ss:$8 sps:$4 sm:$0xff]   ;;  %v1092_v19 = vld [vmem:[#allocation5 + $0x80] ss:$8 sps:$4 sm:$0xff]   ;;  %vm1341_vm0 = vmmov 0  }
  0x51   :  { %499 = vmatpush1.bf16.msra.mxu0 %v1071_v3  ;;  %v904_v14 = vcombine.high %v1437_v13, %v1437_v13  ;;  %v1087_v16 = vld [vmem:[#allocation5 + $0x74] ss:$8 sps:$4 sm:$0xff]   ;;  %v1089_v17 = vld [vmem:[#allocation5 + $0x70] ss:$8 sps:$4 sm:$0xff]   ;;  %v1096_v22 = vld [vmem:[#allocation5 + $0xa4] ss:$8 sps:$4 sm:$0xff]   ;;  %v903_v47 = vcombine.low %v1437_v13, %v1437_v13 }
  0x52   :  { %500 = vmatprep.subr.bf16.mxu0 %v1072_v4  ;;  %v1093_v20 = vld [vmem:[#allocation5 + $0x94] ss:$8 sps:$4 sm:$0xff]   ;;  %v1095_v21 = vld [vmem:[#allocation5 + $0x90] ss:$8 sps:$4 sm:$0xff]   ;;  %v1098_v23 = vld [vmem:[#allocation5 + $0xa0] ss:$8 sps:$4 sm:$0xff]  }
  0x53   :  { %528 = vmatprep.mubr.bf16.mxu0 %v904_v14  ;;  %v1099_v24 = vld [vmem:[#allocation5 + $0xb4] ss:$8 sps:$4 sm:$0xff]   ;;  %v1101_v25 = vld [vmem:[#allocation5 + $0xb0] ss:$8 sps:$4 sm:$0xff]   ;;  %v1102_v26 = vld [vmem:[#allocation5 + $0xc4] ss:$8 sps:$4 sm:$0xff]  }
  0x54   :  { %v1166_v27 = vld [vmem:[#allocation7 + $0x40] sm:$0xff]   ;;  %v1105_v30 = vld [vmem:[#allocation5 + $0xd4] ss:$8 sps:$4 sm:$0xff]   ;;  %v1168_v31 = vld [vmem:[#allocation7 + $0x48] sm:$0xff]   ;;  %s1342_s11 = smov [#allocation10]  }
  0x55   :  { %501 = vmatpush1.bf16.msra.mxu0 %v1074_v5  ;;  %v1104_v28 = vld [vmem:[#allocation5 + $0xc0] ss:$8 sps:$4 sm:$0xff]   ;;  %997 = vmatprep.subr.bf16.mxu1 %v1166_v27  ;;  %v1170_v33 = vld [vmem:[#allocation7 + $0x50] sm:$0xff]   ;;  %v1108_v35 = vld [vmem:[#allocation5 + $0xe4] ss:$8 sps:$4 sm:$0xff]   ;;  %s878_s12 = sshll.u32 %s1342_s11, 4  ;;  %s879_s12 = int_to_ptr.vmem [resolvable:$true] %s878_s12 }
  0x56   :  { %502 = vmatprep.subr.bf16.mxu0 %v1075_v6  ;;  %v1167_v29 = vld [vmem:[#allocation7] sm:$0xff]   ;;  %v1169_v32 = vld [vmem:[#allocation7 + $0x8] sm:$0xff]   ;;  %v1107_v34 = vld [vmem:[#allocation5 + $0xd0] ss:$8 sps:$4 sm:$0xff]   ;;  %s1278_s13 = scalar_lea.vmem %s879_s12, 128  ;;  %p1283_p5 = scmp.lt.s32.totalorder %s879_s12, %s879_s12 }
  0x57   :  { %998 = vmatpush3.bf16.msra.mxu1 %v1167_v29  ;;  %v1171_v36 = vld [vmem:[#allocation7 + $0x10] sm:$0xff]   ;;  %v1172_v37 = vld [vmem:[#allocation7 + $0x58] sm:$0xff]   ;;  %v1110_v38 = vld [vmem:[#allocation5 + $0xe0] ss:$8 sps:$4 sm:$0xff]   ;;  %p1279_p4 = scmp.ne.s32.totalorder %s879_s12, %s1278_s13  ;;  %p1284_p6 = scmp.lt.s32.totalorder %s1278_s13, %s1278_s13 }
  0x58   :  { %999 = vmatprep.subr.bf16.mxu1 %v1168_v31  ;;  %v1111_v39 = vld [vmem:[#allocation5 + $0xf4] ss:$8 sps:$4 sm:$0xff]   ;;  %v1174_v41 = vld [vmem:[#allocation7 + $0x60] sm:$0xff]   ;;  %v1113_v42 = vld [vmem:[#allocation5 + $0xf0] ss:$8 sps:$4 sm:$0xff]  }
  0x59   :  { %503 = vmatpush1.bf16.msra.mxu0 %v1077_v7  ;;  %v1173_v40 = vld [vmem:[#allocation7 + $0x18] sm:$0xff]   ;;  %v1175_v43 = vld [vmem:[#allocation7 + $0x20] sm:$0xff]   ;;  %v1176_v46 = vld [vmem:[#allocation7 + $0x68] sm:$0xff]   ;;  %p1285_p7 = por %p1284_p6, %p1283_p5 }
  0x5a   :  { %504 = vmatprep.subr.bf16.mxu0 %v1078_v8  ;;  %v1118_v44 = vld [vmem:[#allocation5 + $0x104] ss:$8 sps:$4 sm:$0xff]   ;;  %v1441_v45 = vld [vmem:[#allocation2 + $0x8] sm:$0xff]  ;;  %v1116_v48 = vld [vmem:[#allocation5 + $0x100] ss:$8 sps:$4 sm:$0xff]  }
  0x5b   :  { %1000 = vmatpush3.bf16.msra.mxu1 %v1169_v32  ;;  %v906_v49 = vcombine.high %v1441_v45, %v1441_v45  ;;  %v1121_v50 = vld [vmem:[#allocation5 + $0x114] ss:$8 sps:$4 sm:$0xff]   ;;  %v1177_v51 = vld [vmem:[#allocation7 + $0x28] sm:$0xff]   ;;  %v1119_v52 = vld [vmem:[#allocation5 + $0x110] ss:$8 sps:$4 sm:$0xff]   ;;  %p1286_p8 = pnand %p1285_p7, %p1279_p4 }
  0x5c   :  { %1001 = vmatprep.subr.bf16.mxu1 %v1170_v33  ;;  %v1124_v53 = vld [vmem:[#allocation5 + $0x124] ss:$8 sps:$4 sm:$0xff]   ;;  %v1122_v54 = vld [vmem:[#allocation5 + $0x120] ss:$8 sps:$4 sm:$0xff]   ;;  %v1127_v55 = vld [vmem:[#allocation5 + $0x134] ss:$8 sps:$4 sm:$0xff]  }
  0x5d   :  { %505 = vmatpush1.bf16.msra.mxu0 %v1080_v9  ;;  %v1125_v56 = vld [vmem:[#allocation5 + $0x130] ss:$8 sps:$4 sm:$0xff]   ;;  %v1130_v57 = vld [vmem:[#allocation5 + $0x144] ss:$8 sps:$4 sm:$0xff]   ;;  %v1128_v58 = vld [vmem:[#allocation5 + $0x140] ss:$8 sps:$4 sm:$0xff]  }
  0x5e   :  { %506 = vmatprep.subr.bf16.mxu0 %v1081_v10  ;;  %v1133_v59 = vld [vmem:[#allocation5 + $0x154] ss:$8 sps:$4 sm:$0xff]   ;;  %v1131_v60 = vld [vmem:[#allocation5 + $0x150] ss:$8 sps:$4 sm:$0xff]   ;;  %v1136_v61 = vld [vmem:[#allocation5 + $0x164] ss:$8 sps:$4 sm:$0xff]  }
  0x5f   :  { %1002 = vmatpush3.bf16.msra.mxu1 %v1171_v36  ;;  %v1134_v62 = vld [vmem:[#allocation5 + $0x160] ss:$8 sps:$4 sm:$0xff]   ;;  %v1139_v63 = vld [vmem:[#allocation5 + $0x174] ss:$8 sps:$4 sm:$0xff]   ;;  %v1137_v0 = vld [vmem:[#allocation5 + $0x170] ss:$8 sps:$4 sm:$0xff]  }
  0x60   :  { %1003 = vmatprep.subr.bf16.mxu1 %v1172_v37  ;;  %v1142_v1 = vld [vmem:[#allocation5 + $0x184] ss:$8 sps:$4 sm:$0xff]   ;;  %v1140_v2 = vld [vmem:[#allocation5 + $0x180] ss:$8 sps:$4 sm:$0xff]   ;;  %v1145_v3 = vld [vmem:[#allocation5 + $0x194] ss:$8 sps:$4 sm:$0xff]  }
  0x61   :  { %507 = vmatpush1.bf16.msra.mxu0 %v1083_v11  ;;  %v1143_v4 = vld [vmem:[#allocation5 + $0x190] ss:$8 sps:$4 sm:$0xff]   ;;  %v1148_v5 = vld [vmem:[#allocation5 + $0x1a4] ss:$8 sps:$4 sm:$0xff]   ;;  %v1146_v6 = vld [vmem:[#allocation5 + $0x1a0] ss:$8 sps:$4 sm:$0xff]  }
  0x62   :  { %508 = vmatprep.subr.bf16.mxu0 %v1084_v12  ;;  %v1151_v7 = vld [vmem:[#allocation5 + $0x1b4] ss:$8 sps:$4 sm:$0xff]   ;;  %v1149_v8 = vld [vmem:[#allocation5 + $0x1b0] ss:$8 sps:$4 sm:$0xff]   ;;  %v1154_v9 = vld [vmem:[#allocation5 + $0x1c4] ss:$8 sps:$4 sm:$0xff]  }
  0x63   :  { %1004 = vmatpush3.bf16.msra.mxu1 %v1173_v40  ;;  %v1152_v10 = vld [vmem:[#allocation5 + $0x1c0] ss:$8 sps:$4 sm:$0xff]   ;;  %v1157_v11 = vld [vmem:[#allocation5 + $0x1d4] ss:$8 sps:$4 sm:$0xff]   ;;  %v1155_v12 = vld [vmem:[#allocation5 + $0x1d0] ss:$8 sps:$4 sm:$0xff]  }
  0x64   :  { %1005 = vmatprep.subr.bf16.mxu1 %v1174_v41  ;;  %v1160_v13 = vld [vmem:[#allocation5 + $0x1e4] ss:$8 sps:$4 sm:$0xff]   ;;  %v1158_v14 = vld [vmem:[#allocation5 + $0x1e0] ss:$8 sps:$4 sm:$0xff]  }
  0x65   :  { %509 = vmatpush1.bf16.msra.mxu0 %v1086_v15  ;;  %v1163_v15 = vld [vmem:[#allocation5 + $0x1f4] ss:$8 sps:$4 sm:$0xff]   ;;  %v1183_v41 = vld [vmem:[#allocation8 + $0x8] sm:$0xff]  }
  0x66   :  { %510 = vmatprep.subr.bf16.mxu0 %v1087_v16  ;;  %v1161_v16 = vld [vmem:[#allocation5 + $0x1f0] ss:$8 sps:$4 sm:$0xff]  }
  0x67   :  { %1006 = vmatpush3.bf16.msra.mxu1 %v1175_v43  ;;  %v1185_v43 = vld [vmem:[#allocation8 + $0x18] sm:$0xff]  }
  0x68   :  { %1007 = vmatprep.subr.bf16.mxu1 %v1176_v46  ;;  %v1188_v46 = vld [vmem:[#allocation8 + $0x30] sm:$0xff]  }
  0x69   :  { %511 = vmatpush1.bf16.msra.mxu0 %v1089_v17  ;;  %v905_v17 = vcombine.low %v1441_v45, %v1441_v45  ;;  %v1187_v45 = vld [vmem:[#allocation8 + $0x28] sm:$0xff]  }
  0x6a   :  { %512 = vmatprep.subr.bf16.mxu0 %v1090_v18  ;;  %v1178_v18 = vld [vmem:[#allocation7 + $0x70] sm:$0xff]  }
  0x6b   :  { %1008 = vmatpush3.bf16.msra.mxu1 %v1177_v51 }
  0x6c   :  { %1009 = vmatprep.subr.bf16.mxu1 %v1178_v18 }
  0x6d   :  { %513 = vmatpush1.bf16.msra.mxu0 %v1092_v19  ;;  %v1179_v19 = vld [vmem:[#allocation7 + $0x30] sm:$0xff]  }
  0x6e   :  { %514 = vmatprep.subr.bf16.mxu0 %v1093_v20  ;;  %v1180_v20 = vld [vmem:[#allocation7 + $0x78] sm:$0xff]  }
  0x6f   :  { %1010 = vmatpush3.bf16.msra.mxu1 %v1179_v19 }
  0x70   :  { %1011 = vmatprep.subr.bf16.mxu1 %v1180_v20 }
  0x71   :  { %515 = vmatpush1.bf16.msra.mxu0 %v1095_v21  ;;  %v1181_v21 = vld [vmem:[#allocation7 + $0x38] sm:$0xff]  }
  0x72   :  { %516 = vmatprep.subr.bf16.mxu0 %v1096_v22  ;;  %v1340_v22 = vmov 0.0  }
  0x73   :  { %1012 = vmatpush3.bf16.msra.mxu1 %v1181_v21 }
  0x74   :  { %1028 = vmatprep.subr.bf16.mxu1 %v1340_v22 }
  0x75   :  { %517 = vmatpush1.bf16.msra.mxu0 %v1098_v23  ;;  %v152_v23 = vlaneseq }
  0x76   :  { %518 = vmatprep.subr.bf16.mxu0 %v1099_v24 }
  0x77   :  { %v153_v24 = vshrl.u32 %v152_v23, 7 }
  0x79   :  { %519 = vmatpush1.bf16.msra.mxu0 %v1101_v25  ;;  %v154_v25 = vsub.s32 0, %v153_v24  ;;  %v158_v27 = vsub.s32 1, %v153_v24 }
  0x7a   :  { %520 = vmatprep.subr.bf16.mxu0 %v1102_v26  ;;  %v150_v26 = vld [vmem:[%s1484_s2] sm:$0x3] }
  0x7b   :  { %v159_v29 = vrot.slane %v150_v26, %v158_v27 }
  0x7d   :  { %521 = vmatpush1.bf16.msra.mxu0 %v1104_v28  ;;  %v155_v28 = vrot.slane %v150_v26, %v154_v25 }
  0x7e   :  { %522 = vmatprep.subr.bf16.mxu0 %v1105_v30 }
  0x81   :  { %523 = vmatpush1.bf16.msra.mxu0 %v1107_v34 }
  0x82   :  { %524 = vmatprep.subr.bf16.mxu0 %v1108_v35 }
  0x85   :  { %525 = vmatpush1.bf16.msra.mxu0 %v1110_v38 }
  0x86   :  { %526 = vmatprep.subr.bf16.mxu0 %v1111_v39  ;;  %v1182_v39 = vld [vmem:[#allocation8] sm:$0xff]  }
  0x89   :  { %527 = vmatpush1.bf16.msra.mxu0 %v1113_v42  ;;  %v1184_v42 = vld [vmem:[#allocation8 + $0x10] sm:$0xff]  }
  0x8a   :  { %537 = vmatprep.subr.bf16.mxu0 %v1118_v44  ;;  %v1186_v44 = vld [vmem:[#allocation8 + $0x20] sm:$0xff]  }
  0x8c   :  { %529 = vmatmul.mubr.bf16.vlgmr.msra.gmra.mrb[0].mxu0 %v903_v47  ;;  %v1189_v47 = vld [vmem:[#allocation8 + $0x38] sm:$0xff]  }
  0x8d   :  { %538 = vmatpush1.bf16.msra.mxu0 %v1116_v48  ;;  %569 = vmatprep.mubr.bf16.mxu0 %v906_v49  ;;  %v971_v49 = vld [vmem:[%s1486_s4] ss:$0 sm:$0xff] }
  0x8e   :  { %539 = vmatprep.subr.bf16.mxu0 %v1121_v50 }
  0x91   :  { %540 = vmatpush1.bf16.msra.mxu0 %v1119_v52 }
  0x92   :  { %541 = vmatprep.subr.bf16.mxu0 %v1124_v53 }
  0x95   :  { %542 = vmatpush1.bf16.msra.mxu0 %v1122_v54 }
  0x96   :  { %543 = vmatprep.subr.bf16.mxu0 %v1127_v55 }
  0x99   :  { %544 = vmatpush1.bf16.msra.mxu0 %v1125_v56 }
  0x9a   :  { %545 = vmatprep.subr.bf16.mxu0 %v1130_v57 }
  0x9d   :  { %546 = vmatpush1.bf16.msra.mxu0 %v1128_v58 }
  0x9e   :  { %547 = vmatprep.subr.bf16.mxu0 %v1133_v59 }
  0xa1   :  { %548 = vmatpush1.bf16.msra.mxu0 %v1131_v60 }
  0xa2   :  { %549 = vmatprep.subr.bf16.mxu0 %v1136_v61 }
  0xa5   :  { %550 = vmatpush1.bf16.msra.mxu0 %v1134_v62 }
  0xa6   :  { %551 = vmatprep.subr.bf16.mxu0 %v1139_v63 }
  0xa9   :  { %552 = vmatpush1.bf16.msra.mxu0 %v1137_v0 }
  0xaa   :  { %553 = vmatprep.subr.bf16.mxu0 %v1142_v1 }
  0xad   :  { %554 = vmatpush1.bf16.msra.mxu0 %v1140_v2 }
  0xae   :  { %555 = vmatprep.subr.bf16.mxu0 %v1145_v3 }
  0xb1   :  { %556 = vmatpush1.bf16.msra.mxu0 %v1143_v4 }
  0xb2   :  { %557 = vmatprep.subr.bf16.mxu0 %v1148_v5 }
  0xb5   :  { %558 = vmatpush1.bf16.msra.mxu0 %v1146_v6 }
  0xb6   :  { %559 = vmatprep.subr.bf16.mxu0 %v1151_v7 }
  0xb9   :  { %560 = vmatpush1.bf16.msra.mxu0 %v1149_v8 }
  0xba   :  { %561 = vmatprep.subr.bf16.mxu0 %v1154_v9 }
  0xbd   :  { %562 = vmatpush1.bf16.msra.mxu0 %v1152_v10 }
  0xbe   :  { %563 = vmatprep.subr.bf16.mxu0 %v1157_v11 }
  0xc1   :  { %564 = vmatpush1.bf16.msra.mxu0 %v1155_v12 }
  0xc2   :  { %565 = vmatprep.subr.bf16.mxu0 %v1160_v13 }
  0xc5   :  { %566 = vmatpush1.bf16.msra.mxu0 %v1158_v14 }
  0xc6   :  { %567 = vmatprep.subr.bf16.mxu0 %v1163_v15 }
  0xc9   :  { %568 = vmatpush1.bf16.msra.mxu0 %v1161_v16 }
  0xcc   :  { %570 = vmatmul.mubr.bf16.vlgmr.msra.gmra.mrb[0].mxu0 %v905_v17 }
 0x19f   :  { %v571_v30 = vpop.f32.mrb[0].mxu0 }
 0x1a0   :  { %v1048_v31 = vadd.f32 %v571_v30, %v155_v28  ;;  %v573_v32 = vpop.f32.mrb[1].mxu0 }
 0x1a1   :  { %v1049_v33 = vadd.f32 %v573_v32, %v159_v29  ;;  %v575_v34 = vpop.f32.mrb[2].mxu0 }
 0x1a2   :  { %v578_v35 = vmax.f32 %v1048_v31, 0.0  ;;  %v576_v36 = vpop.f32.mrb[3].mxu0 }
 0x1a3   :  { %v579_v37 = vmax.f32 %v1049_v33, 0.0 }
 0x1a4   :  { %v580_v40 = vpack.c.bf16 %v578_v35, %v578_v35 }
 0x1a5   :  { %v581_v38 = vpack.c.bf16 %v579_v37, %v579_v37 }
 0x1a7   :  { %749 = vmatprep.mubr.bf16.mxu1 %v581_v38 }
 0x1a8   :  { %750 = vmatmul.mubr.bf16.vlgmr.msra.gmra.mrb[0].mxu1 %v580_v40 }
 0x1a9   :  { %1029 = vmatpush3.bf16.msra.mxu1 %v1182_v39  ;;  %1044 = vmatprep.mubr.msk.bf16.mxu1 %vm1341_vm0, %v1340_v22 }
 0x1aa   :  { %1030 = vmatprep.subr.bf16.mxu1 %v1340_v22 }
 0x1ad   :  { %1031 = vmatpush3.bf16.msra.mxu1 %v1183_v41 }
 0x1ae   :  { %1032 = vmatprep.subr.bf16.mxu1 %v1340_v22 }
 0x1b1   :  { %1033 = vmatpush3.bf16.msra.mxu1 %v1184_v42 }
 0x1b2   :  { %1034 = vmatprep.subr.bf16.mxu1 %v1340_v22 }
 0x1b5   :  { %1035 = vmatpush3.bf16.msra.mxu1 %v1185_v43 }
 0x1b6   :  { %1036 = vmatprep.subr.bf16.mxu1 %v1340_v22 }
 0x1b9   :  { %1037 = vmatpush3.bf16.msra.mxu1 %v1186_v44 }
 0x1ba   :  { %1038 = vmatprep.subr.bf16.mxu1 %v1340_v22 }
 0x1bd   :  { %1039 = vmatpush3.bf16.msra.mxu1 %v1187_v45 }
 0x1be   :  { %1040 = vmatprep.subr.bf16.mxu1 %v1340_v22 }
 0x1c1   :  { %1041 = vmatpush3.bf16.msra.mxu1 %v1188_v46 }
 0x1c2   :  { %1042 = vmatprep.subr.bf16.mxu1 %v1340_v22 }
 0x1c5   :  { %1043 = vmatpush3.bf16.msra.mxu1 %v1189_v47 }
 0x27b   :  { %v1013_v48 = vpop.f32.mrb[0].mxu1 }
 0x27c   :  { %v1014_v50 = vpop.f32.mrb[1].mxu1 }
 0x27d   :  { %v1015_v51 = vadd.f32 %v1014_v50, %v1013_v48  ;;  %v1016_v52 = vpop.f32.mrb[2].mxu1 }
 0x27e   :  { %v1017_v53 = vpop.f32.mrb[3].mxu1 }
 0x27f   :  { %v752_v54 = vadd.f32 %v1015_v51, %v971_v49 }
 0x281   :  { %v758_v55 = vmax.f32 %v752_v54, 0.0  ;;  %757 = vst [vmem:[#allocation10] sm:$0xff] %v752_v54 }
 0x283   :  { %v759_v56 = vpack.c.bf16 %v758_v55, %v758_v55 }
 0x285   :  { %1045 = vmatmul.mubr.bf16.vlgmr.msra.gmra.mrb[4].mxu1 %v759_v56 }
 0x286   :  { %1289 = shalt.err (!%p1286_p8)
}
 0x287   :  { %s1290_s15 = scalar_lea.hbm %s1489_s7, 128 }
 0x288   :  { %p1291_p9 = scmp.ne.s32.totalorder %s1489_s7, %s1290_s15  ;;  %p1294_p10 = scmp.lt.u32.totalorder %s1290_s15, %s1489_s7 }
 0x28a   :  { %p1296_p11 = pnand %p1294_p10, %p1291_p9 }
 0x28c   :  { %1299 = shalt.err (!%p1296_p11)
}
 0x28d   :  { %881 = dma.vmem_to_hbm [thread:$0]  %s879_s12, 128, %s1489_s7, [#allocation4]   ;;  %v988_v57 = vld [vmem:[%s1488_s6] ss:$0 sm:$0xff] }
 0x28e   :  { %s1343_s24 = smov [#allocation11]  }
 0x28f   :  { %s888_s25 = sshll.u32 %s1343_s24, 4  ;;  %s889_s25 = int_to_ptr.vmem [resolvable:$true] %s888_s25 }
 0x290   :  { %s1300_s26 = scalar_lea.vmem %s889_s25, 128  ;;  %p1305_p13 = scmp.lt.s32.totalorder %s889_s25, %s889_s25 }
 0x291   :  { %p1301_p12 = scmp.ne.s32.totalorder %s889_s25, %s1300_s26  ;;  %p1306_p0 = scmp.lt.s32.totalorder %s1300_s26, %s1300_s26 }
 0x293   :  { %p1307_p1 = por %p1306_p0, %p1305_p13 }
 0x295   :  { %p1308_p2 = pnand %p1307_p1, %p1301_p12 }
 0x358   :  { %v865_v58 = vpop.f32.mrb[4].mxu1 }
 0x359   :  { %v866_v59 = vadd.f32 %v988_v57, %v865_v58  ;;  %v1046_v60 = vpop.f32.mrb[5].mxu1 }
 0x35a   :  { %v868_v61 = vpop.f32.mrb[6].mxu1 }
 0x35b   :  { %871 = vst [vmem:[#allocation11] sm:$0xff] %v866_v59  ;;  %v1047_v62 = vpop.f32.mrb[7].mxu1 }
 0x35c   :  { %1311 = shalt.err (!%p1308_p2)
}
 0x35d   :  { %s1312_s6 = scalar_lea.hbm %s1490_s8, 128 }
 0x35e   :  { %p1313_p3 = scmp.ne.s32.totalorder %s1490_s8, %s1312_s6  ;;  %p1316_p4 = scmp.lt.u32.totalorder %s1312_s6, %s1490_s8 }
 0x360   :  { %p1318_p5 = pnand %p1316_p4, %p1313_p3 }
 0x362   :  { %1321 = shalt.err (!%p1318_p5)
}
 0x363   :  { %891 = dma.vmem_to_hbm [thread:$0]  %s889_s25, 128, %s1490_s8, [#allocation12]  }
 0x364   :  { %1328 = dma.done.wait [#allocation4], 128  }
 0x365   :  { %1329 = vsyncadd [#allocation4], 4294967168 }
 0x366   :  { %1330 = dma.done.wait [#allocation12], 128  }
 0x367   :  { %1331 = vsyncadd [#allocation12], 4294967168 }
 0x368   :  { %898 = vsyncpa [#allocation3], 1 }
 0x369   :  { %899 = vsyncpa [#allocation6], 1 }
 0x36a   :  { %900 = vsyncpa [#allocation9], 1 }
 0x36b   :  { %901 = vsyncpa [#allocation4], 1 }
 0x36c   :  { %902 = vsyncpa [#allocation12], 1 }

</bundles_post_ra>
